<compile_context>
chip_gen: v7x
topology: tpu7x:2x2x1
jax: 0.10.0
libtpu: 0.0.40
codegen_flags: <defaults>
</compile_context>

<pallas_src>
import jax
import jax.numpy as jnp
from jax.experimental import pallas as pl
from jax.experimental.pallas import tpu as pltpu


def _round_up(x, m):
    return ((x + m - 1) // m) * m


def _cdiv(a, b):
    return (a + b - 1) // b


def _linear_kernel(x_ref, w_ref, b_ref, o_ref):
    # x_ref: (TB, F) input dtype, w_ref: (F, Lp) bf16, b_ref: (1, Lp) f32,
    # o_ref: (TB, Lp) output dtype.
    x = x_ref[...].astype(w_ref.dtype)          # cheap VPU cast; MXU runs bf16
    acc = jnp.dot(x, w_ref[...], preferred_element_type=jnp.float32)
    o_ref[...] = (acc + b_ref[...]).astype(o_ref.dtype)   # f32 bias add, single epilogue


def prepare_params(weight, bias, compute_dtype=jnp.bfloat16):
    """One-time (init-time) parameter prep: transpose to (F, Lp), pad labels to a
    lane-dense multiple of 128, cast weight to the MXU compute dtype, keep bias f32.
    Hoisted out of the forward path so it costs nothing per call."""
    L, F = weight.shape
    Lp = _round_up(L, 128)
    w_t = jnp.zeros((F, Lp), dtype=compute_dtype).at[:, :L].set(
        weight.T.astype(compute_dtype))
    b_p = jnp.zeros((1, Lp), dtype=jnp.float32).at[0, :L].set(
        bias.astype(jnp.float32))
    return w_t, b_p


def logistic_regression_forward(x, w_t, b_p, num_labels):
    """x: (B, F); w_t: (F, Lp) pre-transposed/padded weight; b_p: (1, Lp) bias.
    Returns logits of shape (B, num_labels)."""
    B, F = x.shape
    Fw, Lp = w_t.shape
    assert F == Fw, "feature dim mismatch between x and prepared weight"

    x_item = jnp.dtype(x.dtype).itemsize
    w_item = jnp.dtype(w_t.dtype).itemsize
    o_item = x_item  # output keeps x's dtype

    # --- batch tile selection under an explicit VMEM budget -------------------
    # Budget is safe for v7x (64 MiB physical VMEM); weight+bias are resident
    # (single-buffered), x and out tiles are double-buffered by the pipeline.
    # TODO(synk): for very large F*Lp weights (> ~32 MiB) add a K grid axis with
    # an f32 accumulator scratch instead of keeping the weight fully resident.
    vmem_data_budget = 40 * 1024 * 1024
    resident = Fw * Lp * w_item + Lp * 4                 # weight + bias
    per_row = 2 * F * x_item + 2 * Lp * o_item           # 2-buf x tile + 2-buf out tile
    avail = max(vmem_data_budget - resident, 8 * per_row)
    tb_cap = max(8, (avail // per_row) // 8 * 8)

    TB = min(512, int(tb_cap), _round_up(B, 8))
    if B >= 128 and _cdiv(B, TB) < 2:
        # Give the "parallel" batch axis >= 2 steps so v7x megacore uses both TCs.
        TB = min(TB, _round_up(_cdiv(B, 2), 8))
    TB = max(8, (TB // 8) * 8)

    grid = (_cdiv(B, TB),)  # ragged last tile handled by Pallas boundary masking

    vmem_need = 2 * resident + TB * per_row + (2 << 20)  # generous (worst case 2x bufs)
    vmem_limit = int(min(56 * 1024 * 1024, max(vmem_need, 16 * 1024 * 1024)))

    cost = pl.CostEstimate(
        flops=2 * B * F * Lp,
        bytes_accessed=B * F * x_item + Fw * Lp * w_item + B * Lp * o_item + Lp * 4,
        transcendentals=0,
    )

    def run(single_buffer_params):
        if single_buffer_params:
            # Weight / bias blocks are grid-invariant: single-buffer them to
            # halve their VMEM footprint (headroom for a bigger batch tile).
            w_spec = pl.BlockSpec((Fw, Lp), lambda i: (0, 0),
                                  pipeline_mode=pl.Buffered(1))
            b_spec = pl.BlockSpec((1, Lp), lambda i: (0, 0),
                                  pipeline_mode=pl.Buffered(1))
        else:
            w_spec = pl.BlockSpec((Fw, Lp), lambda i: (0, 0))
            b_spec = pl.BlockSpec((1, Lp), lambda i: (0, 0))

        return pl.pallas_call(
            _linear_kernel,
            out_shape=jax.ShapeDtypeStruct((B, Lp), x.dtype),
            grid_spec=pltpu.PrefetchScalarGridSpec(
                num_scalar_prefetch=0,
                grid=grid,
                in_specs=[
                    # x tile: last dim equals the full (un-padded) array width,
                    # so no F padding and no extra HBM copy of x is ever made.
                    pl.BlockSpec((TB, F), lambda i: (i, 0)),
                    w_spec,
                    b_spec,
                ],
                out_specs=pl.BlockSpec((TB, Lp), lambda i: (i, 0)),
            ),
            compiler_params=pltpu.CompilerParams(
                dimension_semantics=("parallel",),   # batch tiles split across TCs
                vmem_limit_bytes=vmem_limit,
            ),
            cost_estimate=cost,
        )(x, w_t, b_p)

    try:
        out_p = run(True)
    except Exception:
        # Fallback if this Pallas build rejects single-buffered (Buffered(1)) specs.
        out_p = run(False)

    if Lp == num_labels:
        return out_p
    return out_p[:, :num_labels]


if __name__ == "__main__":
    num_features = 32
    num_labels = 16
    batch = 8

    key = jax.random.PRNGKey(0)
    kx, kw, kb = jax.random.split(key, 3)

    # Deterministic parameter init (mimics nn.Linear uniform(-1/sqrt(F), 1/sqrt(F)))
    bound = 1.0 / (num_features ** 0.5)
    weight = jax.random.uniform(kw, (num_labels, num_features),
                                minval=-bound, maxval=bound, dtype=jnp.float32)
    bias = jax.random.uniform(kb, (num_labels,),
                              minval=-bound, maxval=bound, dtype=jnp.float32)
    x = jax.random.normal(kx, (batch, num_features), dtype=jnp.float32)

    # One-time parameter prep (hoisted out of the per-call forward path).
    w_t, b_p = prepare_params(weight, bias, compute_dtype=jnp.bfloat16)

    out = logistic_regression_forward(x, w_t, b_p, num_labels)
    out = jax.block_until_ready(out)

    # Reference check in plain JAX. bf16 MXU inputs (f32 accumulate) lose a few
    # decimal digits vs. the pure-f32 reference, so the tolerance is loosened.
    ref = x @ weight.T + bias
    assert out.shape == (batch, num_labels)
    assert jnp.allclose(out, ref.astype(out.dtype), atol=2e-2, rtol=2e-2)

    print("KERNEL_OK")
</pallas_src>

<mosaic_0001>
module attributes {stable_mosaic.version = 11 : i64} {
  func.func @_linear_kernel(%arg0: i32, %arg1: memref<8x32xf32, #tpu.memory_space<vmem>>, %arg2: memref<32x128xbf16, #tpu.memory_space<vmem>>, %arg3: memref<1x128xf32, #tpu.memory_space<vmem>>, %arg4: memref<8x128xf32, #tpu.memory_space<vmem>>) attributes {dimension_semantics = [#tpu.dimension_semantics<parallel>], iteration_bounds = array<i64: 1>, scalar_prefetch = 0 : i64, scratch_operands = 0 : i64, tpu.core_type = #tpu.core_type<tc>, window_params = [{transform_indices = @transform_0, window_bounds = array<i64: 8, 32>}, {pipeline_mode = #tpu.pipeline_mode<synchronous>, transform_indices = @transform_1, window_bounds = array<i64: 32, 128>}, {pipeline_mode = #tpu.pipeline_mode<synchronous>, transform_indices = @transform_2, window_bounds = array<i64: 1, 128>}, {transform_indices = @transform_3, window_bounds = array<i64: 8, 128>}]} {
    %c0 = arith.constant 0 : index
    %c0_0 = arith.constant 0 : index
    %0 = vector.load %arg1[%c0, %c0_0] : memref<8x32xf32, #tpu.memory_space<vmem>>, vector<8x32xf32>
    %1 = arith.truncf %0 : vector<8x32xf32> to vector<8x32xbf16>
    %c0_1 = arith.constant 0 : index
    %c0_2 = arith.constant 0 : index
    %2 = vector.load %arg2[%c0_1, %c0_2] : memref<32x128xbf16, #tpu.memory_space<vmem>>, vector<32x128xbf16>
    %cst = arith.constant dense<0.000000e+00> : vector<8x128xf32>
    %3 = tpu.matmul %1, %2, %cst {dimension_numbers = #tpu.dot_dimension_numbers<[1], [0], [0], [1], [0, 0, 1, 1], [], []>} : vector<8x32xbf16>, vector<32x128xbf16>, vector<8x128xf32> -> vector<8x128xf32>
    %c0_3 = arith.constant 0 : index
    %c0_4 = arith.constant 0 : index
    %4 = vector.load %arg3[%c0_3, %c0_4] : memref<1x128xf32, #tpu.memory_space<vmem>>, vector<1x128xf32>
    %5 = vector.broadcast %4 : vector<1x128xf32> to vector<8x128xf32>
    %6 = arith.addf %3, %5 : vector<8x128xf32>
    %c0_5 = arith.constant 0 : index
    %c0_6 = arith.constant 0 : index
    %7 = vector.load %arg4[%c0_5, %c0_6] : memref<8x128xf32, #tpu.memory_space<vmem>>, vector<8x128xf32>
    tpu.vector_store %arg4[%c0_5, %c0_6], %6 {strides = array<i32>} : memref<8x128xf32, #tpu.memory_space<vmem>>, vector<8x128xf32>,
    return
  }
  func.func @transform_0(%arg0: i32) -> (i32, i32) {
    %c0_i32 = arith.constant 0 : i32
    %c0_i32_0 = arith.constant 0 : i32
    return %arg0, %c0_i32 : i32, i32
  }
  func.func @transform_1(%arg0: i32) -> (i32, i32) {
    %c0_i32 = arith.constant 0 : i32
    %c0_i32_0 = arith.constant 0 : i32
    %c0_i32_1 = arith.constant 0 : i32
    return %c0_i32, %c0_i32_0 : i32, i32
  }
  func.func @transform_2(%arg0: i32) -> (i32, i32) {
    %c0_i32 = arith.constant 0 : i32
    %c0_i32_0 = arith.constant 0 : i32
    %c0_i32_1 = arith.constant 0 : i32
    return %c0_i32, %c0_i32_0 : i32, i32
  }
  func.func @transform_3(%arg0: i32) -> (i32, i32) {
    %c0_i32 = arith.constant 0 : i32
    %c0_i32_0 = arith.constant 0 : i32
    return %arg0, %c0_i32 : i32, i32
  }
}

module attributes {stable_mosaic.version = 11 : i64} {
  func.func @_linear_kernel(%arg0: i32, %arg1: memref<8x32xf32, #tpu.memory_space<vmem>>, %arg2: memref<32x128xbf16, #tpu.memory_space<vmem>>, %arg3: memref<1x128xf32, #tpu.memory_space<vmem>>, %arg4: memref<8x128xf32, #tpu.memory_space<vmem>>) attributes {dimension_semantics = [#tpu.dimension_semantics<parallel>], iteration_bounds = array<i64: 1>, scalar_prefetch = 0 : i64, scratch_operands = 0 : i64, tpu.core_type = #tpu.core_type<tc>, window_params = [{transform_indices = @transform_0, window_bounds = array<i64: 8, 32>}, {pipeline_mode = #tpu.pipeline_mode<synchronous>, transform_indices = @transform_1, window_bounds = array<i64: 32, 128>}, {pipeline_mode = #tpu.pipeline_mode<synchronous>, transform_indices = @transform_2, window_bounds = array<i64: 1, 128>}, {transform_indices = @transform_3, window_bounds = array<i64: 8, 128>}]} {
    %c0 = arith.constant 0 : index
    %c0_0 = arith.constant 0 : index
    %0 = vector.load %arg1[%c0, %c0_0] : memref<8x32xf32, #tpu.memory_space<vmem>>, vector<8x32xf32>
    %1 = arith.truncf %0 : vector<8x32xf32> to vector<8x32xbf16>
    %c0_1 = arith.constant 0 : index
    %c0_2 = arith.constant 0 : index
    %2 = vector.load %arg2[%c0_1, %c0_2] : memref<32x128xbf16, #tpu.memory_space<vmem>>, vector<32x128xbf16>
    %cst = arith.constant dense<0.000000e+00> : vector<8x128xf32>
    %3 = tpu.matmul %1, %2, %cst {dimension_numbers = #tpu.dot_dimension_numbers<[1], [0], [0], [1], [0, 0, 1, 1], [], []>} : vector<8x32xbf16>, vector<32x128xbf16>, vector<8x128xf32> -> vector<8x128xf32>
    %c0_3 = arith.constant 0 : index
    %c0_4 = arith.constant 0 : index
    %4 = vector.load %arg3[%c0_3, %c0_4] : memref<1x128xf32, #tpu.memory_space<vmem>>, vector<1x128xf32>
    %5 = vector.broadcast %4 : vector<1x128xf32> to vector<8x128xf32>
    %6 = arith.addf %3, %5 : vector<8x128xf32>
    %c0_5 = arith.constant 0 : index
    %c0_6 = arith.constant 0 : index
    %7 = vector.load %arg4[%c0_5, %c0_6] : memref<8x128xf32, #tpu.memory_space<vmem>>, vector<8x128xf32>
    tpu.vector_store %arg4[%c0_5, %c0_6], %6 {strides = array<i32>} : memref<8x128xf32, #tpu.memory_space<vmem>>, vector<8x128xf32>,
    return
  }
  func.func @transform_0(%arg0: i32) -> (i32, i32) {
    %c0_i32 = arith.constant 0 : i32
    %c0_i32_0 = arith.constant 0 : i32
    return %arg0, %c0_i32 : i32, i32
  }
  func.func @transform_1(%arg0: i32) -> (i32, i32) {
    %c0_i32 = arith.constant 0 : i32
    %c0_i32_0 = arith.constant 0 : i32
    %c0_i32_1 = arith.constant 0 : i32
    return %c0_i32, %c0_i32_0 : i32, i32
  }
  func.func @transform_2(%arg0: i32) -> (i32, i32) {
    %c0_i32 = arith.constant 0 : i32
    %c0_i32_0 = arith.constant 0 : i32
    %c0_i32_1 = arith.constant 0 : i32
    return %c0_i32, %c0_i32_0 : i32, i32
  }
  func.func @transform_3(%arg0: i32) -> (i32, i32) {
    %c0_i32 = arith.constant 0 : i32
    %c0_i32_0 = arith.constant 0 : i32
    return %arg0, %c0_i32 : i32, i32
  }
}

</mosaic_0001>

<bundles_post_ra>
// kernel: tpu_custom_call.1
= control target key start
LH: loop header
LB: loop body
LE: loop exit
PB: predicated region body
PF: predicated region fallthrough
CT: control target
= control target key end

     0   :  { %8 = vsyncpa [#allocation3], 0  ;;  %s297_s0 = inlined_call_operand.hbm [shape: f32[8,32], index: 0, kind: input, shape index: {}]   ;;  %s298_s1 = inlined_call_operand.hbm [shape: bf16[32,128], index: 1, kind: input, shape index: {}]   ;;  %s299_s2 = inlined_call_operand.vmem [shape: f32[1,128], index: 2, kind: input, shape index: {}]   ;;  %s300_s3 = inlined_call_operand.hbm [shape: f32[8,128], index: 3, kind: output, shape index: {}]  }
   0x1   :  { %9 = vsyncpa [#allocation6], 0 }
   0x2   :  { %10 = vsyncpa [#allocation4], 0  ;;  %s224_s12 = smov [#allocation2]   ;;  %s225_s14 = smov [#allocation5]  }
   0x3   :  { %s17_s13 = sshll.u32 %s224_s12, 4  ;;  %s26_s15 = sshll.u32 %s225_s14, 4  ;;  %s18_s13 = int_to_ptr.vmem [resolvable:$true] %s17_s13  ;;  %s251_s15 = int_to_ptr.vmem [resolvable:$true] %s26_s15 }
   0x4   :  { %s152_s18 = scalar_lea.hbm %s297_s0, 128 }
   0x5   :  { %p153_p0 = scmp.ne.s32.totalorder %s297_s0, %s152_s18  ;;  %p156_p1 = scmp.lt.u32.totalorder %s152_s18, %s297_s0 }
   0x7   :  { %p158_p2 = pnand %p156_p1, %p153_p0 }
   0x9   :  { %161 = shalt.err (!%p158_p2)
}
   0xa   :  { %s162_s23 = scalar_lea.vmem %s18_s13, 128  ;;  %p167_p4 = scmp.lt.s32.totalorder %s18_s13, %s18_s13 }
   0xb   :  { %p163_p3 = scmp.ne.s32.totalorder %s18_s13, %s162_s23  ;;  %p168_p5 = scmp.lt.s32.totalorder %s162_s23, %s162_s23 }
   0xd   :  { %p169_p6 = por %p168_p5, %p167_p4 }
   0xf   :  { %p170_p7 = pnand %p169_p6, %p163_p3 }
  0x11   :  { %173 = shalt.err (!%p170_p7)
}
  0x12   :  { %20 = dma.hbm_to_vmem [thread:$0]  %s297_s0, 128, %s18_s13, [#allocation3]  }
  0x13   :  { %s174_s28 = scalar_lea.hbm %s298_s1, 256 }
  0x14   :  { %p175_p8 = scmp.ne.s32.totalorder %s298_s1, %s174_s28  ;;  %p178_p9 = scmp.lt.u32.totalorder %s174_s28, %s298_s1 }
  0x16   :  { %p180_p10 = pnand %p178_p9, %p175_p8 }
  0x18   :  { %183 = shalt.err (!%p180_p10)
}
  0x19   :  { %s184_s6 = scalar_lea.vmem %s251_s15, 256  ;;  %p189_p12 = scmp.lt.s32.totalorder %s251_s15, %s251_s15 }
  0x1a   :  { %p185_p11 = scmp.ne.s32.totalorder %s251_s15, %s184_s6  ;;  %p190_p13 = scmp.lt.s32.totalorder %s184_s6, %s184_s6 }
  0x1c   :  { %p191_p0 = por %p190_p13, %p189_p12 }
  0x1e   :  { %p192_p1 = pnand %p191_p0, %p185_p11 }
  0x20   :  { %195 = shalt.err (!%p192_p1)
}
  0x21   :  { %s226_s0 = smov 64   ;;  %s227_s7 = smov 4  }
  0x22   :  { %32 = dma.hbm_to_vmem [thread:$0]  %s298_s1, 256, %s251_s15, [#allocation6], %s226_s0, %s226_s0, %s227_s7  }
  0x23   :  { %218 = dma.done.wait [#allocation3], 128  }
  0x24   :  { %219 = vsyncadd [#allocation3], 4294967168 }
  0x25   :  { %220 = dma.done.wait [#allocation6], 256  }
  0x26   :  { %221 = vsyncadd [#allocation6], 4294967040  ;;  %v228_v0 = vmov 0.0   ;;  %vm229_vm0 = vmmov 0   ;;  %v150_v1 = vld [vmem:[#allocation5] sm:$0xff]   ;;  %v151_v2 = vld [vmem:[#allocation5 + $0x8] sm:$0xff]  }
  0x27   :  { %135 = vmatprep.subr.bf16.mxu0 %v228_v0  ;;  %139 = vmatprep.mubr.msk.bf16.mxu0 %vm229_vm0, %v228_v0  ;;  %v42_v3 = vld [vmem:[#allocation2] sm:$0xff]  ;;  %vm67_vm1 = vcmask 261120   ;;  %s230_s1 = smov [#allocation7]  }
  0x28   :  { %136 = vmatpush3.bf16.msra.mxu0 %v150_v1  ;;  %v43_v4 = vpack.c.bf16 %v42_v3, %v42_v3  ;;  %v128_v5 = vld [vmem:[%s299_s2] ss:$0 sm:$0xff]  ;;  %s118_s12 = sshll.u32 %s230_s1, 4  ;;  %s119_s12 = int_to_ptr.vmem [resolvable:$true] %s118_s12 }
  0x29   :  { %137 = vmatprep.subr.bf16.mxu0 %v228_v0  ;;  %s196_s13 = scalar_lea.vmem %s119_s12, 128  ;;  %p201_p3 = scmp.lt.s32.totalorder %s119_s12, %s119_s12 }
  0x2a   :  { %p197_p2 = scmp.ne.s32.totalorder %s119_s12, %s196_s13  ;;  %p202_p4 = scmp.lt.s32.totalorder %s196_s13, %s196_s13 }
  0x2c   :  { %138 = vmatpush3.bf16.msra.mxu0 %v151_v2  ;;  %p203_p5 = por %p202_p4, %p201_p3 }
  0x2e   :  { %p204_p6 = pnand %p203_p5, %p197_p2 }
  0x2f   :  { %140 = vmatmul.mubr.msk.bf16.vlgmr.msra.gmra.mrb[0].mxu0 %vm67_vm1, %v43_v4 }
 0x102   :  { %v105_v6 = vpop.f32.mrb[0].mxu0 }
 0x103   :  { %v106_v7 = vadd.f32 %v128_v5, %v105_v6  ;;  %v141_v8 = vpop.f32.mrb[1].mxu0 }
 0x104   :  { %v108_v9 = vpop.f32.mrb[2].mxu0 }
 0x105   :  { %111 = vst [vmem:[#allocation7] sm:$0xff] %v106_v7  ;;  %v142_v10 = vpop.f32.mrb[3].mxu0 }
 0x106   :  { %207 = shalt.err (!%p204_p6)
}
 0x107   :  { %s208_s2 = scalar_lea.hbm %s300_s3, 128 }
 0x108   :  { %p209_p7 = scmp.ne.s32.totalorder %s300_s3, %s208_s2  ;;  %p212_p8 = scmp.lt.u32.totalorder %s208_s2, %s300_s3 }
 0x10a   :  { %p214_p9 = pnand %p212_p8, %p209_p7 }
 0x10c   :  { %217 = shalt.err (!%p214_p9)
}
 0x10d   :  { %121 = dma.vmem_to_hbm [thread:$0]  %s119_s12, 128, %s300_s3, [#allocation4]  }
 0x10e   :  { %222 = dma.done.wait [#allocation4], 128  }
 0x10f   :  { %223 = vsyncadd [#allocation4], 4294967168 }
 0x110   :  { %125 = vsyncpa [#allocation3], 1 }
 0x111   :  { %126 = vsyncpa [#allocation6], 1 }
 0x112   :  { %127 = vsyncpa [#allocation4], 1 }

// kernel: tpu_custom_call.1
= control target key start
LH: loop header
LB: loop body
LE: loop exit
PB: predicated region body
PF: predicated region fallthrough
CT: control target
= control target key end

     0   :  { %8 = vsyncpa [#allocation3], 0  ;;  %s297_s0 = inlined_call_operand.hbm [shape: f32[8,32], index: 0, kind: input, shape index: {}]   ;;  %s298_s1 = inlined_call_operand.hbm [shape: bf16[32,128], index: 1, kind: input, shape index: {}]   ;;  %s299_s2 = inlined_call_operand.vmem [shape: f32[1,128], index: 2, kind: input, shape index: {}]   ;;  %s300_s3 = inlined_call_operand.hbm [shape: f32[8,128], index: 3, kind: output, shape index: {}]  }
   0x1   :  { %9 = vsyncpa [#allocation6], 0 }
   0x2   :  { %10 = vsyncpa [#allocation4], 0  ;;  %s224_s12 = smov [#allocation2]   ;;  %s225_s14 = smov [#allocation5]  }
   0x3   :  { %s17_s13 = sshll.u32 %s224_s12, 4  ;;  %s26_s15 = sshll.u32 %s225_s14, 4  ;;  %s18_s13 = int_to_ptr.vmem [resolvable:$true] %s17_s13  ;;  %s251_s15 = int_to_ptr.vmem [resolvable:$true] %s26_s15 }
   0x4   :  { %s152_s18 = scalar_lea.hbm %s297_s0, 128 }
   0x5   :  { %p153_p0 = scmp.ne.s32.totalorder %s297_s0, %s152_s18  ;;  %p156_p1 = scmp.lt.u32.totalorder %s152_s18, %s297_s0 }
   0x7   :  { %p158_p2 = pnand %p156_p1, %p153_p0 }
   0x9   :  { %161 = shalt.err (!%p158_p2)
}
   0xa   :  { %s162_s23 = scalar_lea.vmem %s18_s13, 128  ;;  %p167_p4 = scmp.lt.s32.totalorder %s18_s13, %s18_s13 }
   0xb   :  { %p163_p3 = scmp.ne.s32.totalorder %s18_s13, %s162_s23  ;;  %p168_p5 = scmp.lt.s32.totalorder %s162_s23, %s162_s23 }
   0xd   :  { %p169_p6 = por %p168_p5, %p167_p4 }
   0xf   :  { %p170_p7 = pnand %p169_p6, %p163_p3 }
  0x11   :  { %173 = shalt.err (!%p170_p7)
}
  0x12   :  { %20 = dma.hbm_to_vmem [thread:$0]  %s297_s0, 128, %s18_s13, [#allocation3]  }
  0x13   :  { %s174_s28 = scalar_lea.hbm %s298_s1, 256 }
  0x14   :  { %p175_p8 = scmp.ne.s32.totalorder %s298_s1, %s174_s28  ;;  %p178_p9 = scmp.lt.u32.totalorder %s174_s28, %s298_s1 }
  0x16   :  { %p180_p10 = pnand %p178_p9, %p175_p8 }
  0x18   :  { %183 = shalt.err (!%p180_p10)
}
  0x19   :  { %s184_s6 = scalar_lea.vmem %s251_s15, 256  ;;  %p189_p12 = scmp.lt.s32.totalorder %s251_s15, %s251_s15 }
  0x1a   :  { %p185_p11 = scmp.ne.s32.totalorder %s251_s15, %s184_s6  ;;  %p190_p13 = scmp.lt.s32.totalorder %s184_s6, %s184_s6 }
  0x1c   :  { %p191_p0 = por %p190_p13, %p189_p12 }
  0x1e   :  { %p192_p1 = pnand %p191_p0, %p185_p11 }
  0x20   :  { %195 = shalt.err (!%p192_p1)
}
  0x21   :  { %s226_s0 = smov 64   ;;  %s227_s7 = smov 4  }
  0x22   :  { %32 = dma.hbm_to_vmem [thread:$0]  %s298_s1, 256, %s251_s15, [#allocation6], %s226_s0, %s226_s0, %s227_s7  }
  0x23   :  { %218 = dma.done.wait [#allocation3], 128  }
  0x24   :  { %219 = vsyncadd [#allocation3], 4294967168 }
  0x25   :  { %220 = dma.done.wait [#allocation6], 256  }
  0x26   :  { %221 = vsyncadd [#allocation6], 4294967040  ;;  %v228_v0 = vmov 0.0   ;;  %vm229_vm0 = vmmov 0   ;;  %v150_v1 = vld [vmem:[#allocation5] sm:$0xff]   ;;  %v151_v2 = vld [vmem:[#allocation5 + $0x8] sm:$0xff]  }
  0x27   :  { %135 = vmatprep.subr.bf16.mxu0 %v228_v0  ;;  %139 = vmatprep.mubr.msk.bf16.mxu0 %vm229_vm0, %v228_v0  ;;  %v42_v3 = vld [vmem:[#allocation2] sm:$0xff]  ;;  %vm67_vm1 = vcmask 261120   ;;  %s230_s1 = smov [#allocation7]  }
  0x28   :  { %136 = vmatpush3.bf16.msra.mxu0 %v150_v1  ;;  %v43_v4 = vpack.c.bf16 %v42_v3, %v42_v3  ;;  %v128_v5 = vld [vmem:[%s299_s2] ss:$0 sm:$0xff]  ;;  %s118_s12 = sshll.u32 %s230_s1, 4  ;;  %s119_s12 = int_to_ptr.vmem [resolvable:$true] %s118_s12 }
  0x29   :  { %137 = vmatprep.subr.bf16.mxu0 %v228_v0  ;;  %s196_s13 = scalar_lea.vmem %s119_s12, 128  ;;  %p201_p3 = scmp.lt.s32.totalorder %s119_s12, %s119_s12 }
  0x2a   :  { %p197_p2 = scmp.ne.s32.totalorder %s119_s12, %s196_s13  ;;  %p202_p4 = scmp.lt.s32.totalorder %s196_s13, %s196_s13 }
  0x2c   :  { %138 = vmatpush3.bf16.msra.mxu0 %v151_v2  ;;  %p203_p5 = por %p202_p4, %p201_p3 }
  0x2e   :  { %p204_p6 = pnand %p203_p5, %p197_p2 }
  0x2f   :  { %140 = vmatmul.mubr.msk.bf16.vlgmr.msra.gmra.mrb[0].mxu0 %vm67_vm1, %v43_v4 }
 0x102   :  { %v105_v6 = vpop.f32.mrb[0].mxu0 }
 0x103   :  { %v106_v7 = vadd.f32 %v128_v5, %v105_v6  ;;  %v141_v8 = vpop.f32.mrb[1].mxu0 }
 0x104   :  { %v108_v9 = vpop.f32.mrb[2].mxu0 }
 0x105   :  { %111 = vst [vmem:[#allocation7] sm:$0xff] %v106_v7  ;;  %v142_v10 = vpop.f32.mrb[3].mxu0 }
 0x106   :  { %207 = shalt.err (!%p204_p6)
}
 0x107   :  { %s208_s2 = scalar_lea.hbm %s300_s3, 128 }
 0x108   :  { %p209_p7 = scmp.ne.s32.totalorder %s300_s3, %s208_s2  ;;  %p212_p8 = scmp.lt.u32.totalorder %s208_s2, %s300_s3 }
 0x10a   :  { %p214_p9 = pnand %p212_p8, %p209_p7 }
 0x10c   :  { %217 = shalt.err (!%p214_p9)
}
 0x10d   :  { %121 = dma.vmem_to_hbm [thread:$0]  %s119_s12, 128, %s300_s3, [#allocation4]  }
 0x10e   :  { %222 = dma.done.wait [#allocation4], 128  }
 0x10f   :  { %223 = vsyncadd [#allocation4], 4294967168 }
 0x110   :  { %125 = vsyncpa [#allocation3], 1 }
 0x111   :  { %126 = vsyncpa [#allocation6], 1 }
 0x112   :  { %127 = vsyncpa [#allocation4], 1 }

</bundles_post_ra>
